<compile_context>
chip_gen: v6e
topology: v6e:2x2x1
jax: 0.10.0
libtpu: 0.0.40
codegen_flags: <defaults>
</compile_context>

<pallas_src>
import functools

import jax
import jax.numpy as jnp
import numpy as np
from jax.experimental import pallas as pl
from jax.experimental.pallas import tpu as pltpu


def _pointer_kernel(has_mask, matmul_dtype, *refs):
    if has_mask:
        x_ref, mask_ref, wt_ref, b_ref, qv_ref, out_ref = refs
    else:
        x_ref, wt_ref, b_ref, qv_ref, out_ref = refs

    tb, ts, h = x_ref.shape
    # (tb, ts, H) -> (tb*ts, H): layout-free when ts is a sublane multiple (8); otherwise still
    # correct but inserts a relayout copy.
    x2 = x_ref[...].reshape(tb * ts, h)

    # self.transform (+ folded query_transform as part of b_ref): one MXU matmul per block,
    # f32 accumulation.
    ht = jnp.dot(
        x2.astype(matmul_dtype),
        wt_ref[...].astype(matmul_dtype),
        preferred_element_type=jnp.float32,
    ) + b_ref[...]

    t = jnp.tanh(ht)  # EUP

    # Contraction with query_vector over H -> (tb, ts); seq stays lane-dense in the output.
    scores = jnp.sum(t.reshape(tb, ts, h) * qv_ref[...], axis=-1)

    if has_mask:
        # masked_fill_(~mask, -inf): nonzero == keep; -inf is the module's actual output value.
        scores = jnp.where(mask_ref[...] != 0, scores, -jnp.inf)

    out_ref[...] = scores.astype(out_ref.dtype)


def _const_spec(block_shape, single_buffer):
    """BlockSpec for a grid-invariant operand (index_map always (0,...,0))."""
    nd = len(block_shape)
    kwargs = {}
    if single_buffer:
        # Constant blocks never change across the grid; double-buffering them only burns VMEM.
        kwargs["pipeline_mode"] = pl.Buffered(1)
    return pl.BlockSpec(block_shape, lambda *_: (0,) * nd, **kwargs)


def init_params(key, hidden_size, use_query_vector=True):
    """Deterministic init. Weights stored as (in, out) so the math is x @ W + b."""
    ks = jax.random.split(key, 6)
    params = {
        "wt": 0.1 * jax.random.normal(ks[0], (hidden_size, hidden_size), jnp.float32),
        "bt": 0.1 * jax.random.normal(ks[1], (hidden_size,), jnp.float32),
        # PyTorch query_vector has shape (1, H, 1); stored flat as (H,).
        "qv": jax.random.normal(ks[2], (hidden_size,), jnp.float32),
    }
    if use_query_vector:
        params["wq"] = 0.1 * jax.random.normal(ks[3], (hidden_size, hidden_size), jnp.float32)
        params["bq"] = 0.1 * jax.random.normal(ks[4], (hidden_size,), jnp.float32)
    return params


def pointer_network(x, query, mask, params, *, batch_block=8, seq_block=None,
                    matmul_dtype=jnp.bfloat16, single_buffer_constants=True,
                    vmem_limit_bytes=None):
    """x: (B, S, H) f32, query: (H,) f32 or None, mask: (B, S) bool (True = keep) or None.
    Returns (B, S) f32 scores with masked positions set to -inf (matches the PyTorch module)."""
    B, S, H = x.shape
    has_mask = mask is not None

    # ---- tiling -------------------------------------------------------------------------
    tb = min(batch_block, B)
    assert B % tb == 0, "batch must be divisible by the batch block"
    assert tb == B or tb % 8 == 0, "batch block must be a sublane multiple (8) unless it covers B"
    # v7x megacore: make sure the parallel batch axis has >= 2 steps when the batch allows it.
    if B // tb < 2:
        for cand in (B // 2, B // 4):
            if cand and B % cand == 0 and cand % 8 == 0:
                tb = cand
                break

    if seq_block is None:
        # Lane-dense seq tiles (multiples of 128) when possible, else one full-S block.
        ts = min(S, 512) if S % 128 == 0 else S
    else:
        ts = seq_block
    assert S % ts == 0, "seq must be divisible by the seq block"
    assert ts == S or ts % 128 == 0, "seq block must be a lane multiple (128) unless it covers S"

    grid = (B // tb, S // ts)

    # ---- fold query_transform into an effective bias (removes wq from the kernel) --------
    b_eff = params["bt"]
    if query is not None:
        b_eff = b_eff + query @ params["wq"] + params["bq"]
    b_eff = b_eff.astype(jnp.float32).reshape(1, H)

    # Store the matmul operands in matmul_dtype in HBM (halves x DMA + weight VMEM for bf16).
    x_in = x.astype(matmul_dtype)
    wt_in = params["wt"].astype(matmul_dtype)
    qv_in = params["qv"].astype(jnp.float32).reshape(1, H)

    args = [x_in]
    specs = [pl.BlockSpec((tb, ts, H), lambda i, j: (i, j, 0))]          # x, batch+seq tiled
    if has_mask:
        args.append(mask.astype(jnp.int32))
        specs.append(pl.BlockSpec((tb, ts), lambda i, j: (i, j)))        # mask, batch+seq tiled
    args += [wt_in, b_eff, qv_in]
    specs += [
        _const_spec((H, H), single_buffer_constants),                    # transform weight
        _const_spec((1, H), single_buffer_constants),                    # effective bias
        _const_spec((1, H), single_buffer_constants),                    # query_vector row
    ]

    mm_bytes = jnp.dtype(matmul_dtype).itemsize
    cost = pl.CostEstimate(
        flops=2 * B * S * H * H + 2 * B * S * H,
        transcendentals=B * S * H,
        bytes_accessed=(B * S * H * mm_bytes        # x
                        + H * H * mm_bytes          # wt
                        + 2 * H * 4                 # b_eff + qv
                        + (B * S * 4 if has_mask else 0)
                        + B * S * 4),               # out
    )

    cp_kwargs = dict(dimension_semantics=("parallel", "parallel"))
    if vmem_limit_bytes is not None:
        cp_kwargs["vmem_limit_bytes"] = vmem_limit_bytes

    kernel = functools.partial(_pointer_kernel, has_mask, matmul_dtype)

    return pl.pallas_call(
        kernel,
        out_shape=jax.ShapeDtypeStruct((B, S), jnp.float32),
        grid=grid,
        in_specs=specs,
        out_specs=pl.BlockSpec((tb, ts), lambda i, j: (i, j)),
        compiler_params=pltpu.CompilerParams(**cp_kwargs),
        cost_estimate=cost,
    )(*args)


def pointer_network_ref(x, query, mask, params):
    """Pure-JAX reference mirroring the PyTorch forward."""
    h = x @ params["wt"] + params["bt"]
    if query is not None:
        h = h + (query @ params["wq"] + params["bq"])
    t = jnp.tanh(h)
    scores = jnp.einsum("bsh,h->bs", t, params["qv"])
    if mask is not None:
        scores = jnp.where(mask, scores, -jnp.inf)
    return scores


if __name__ == "__main__":
    # Small shapes: batch 16 (two grid blocks of 8 -> exercises pipelining / megacore),
    # seq 16, hidden 32, with a query vector and a keep-mask.
    B, S, H = 16, 16, 32

    key = jax.random.PRNGKey(0)
    kx, kq, km, kp = jax.random.split(key, 4)

    x = jax.random.normal(kx, (B, S, H), jnp.float32)
    query = jax.random.normal(kq, (H,), jnp.float32)
    mask = jax.random.bernoulli(km, 0.8, (B, S))     # True = keep, False = fill with -inf

    params = init_params(kp, H, use_query_vector=True)

    ref = jax.block_until_ready(pointer_network_ref(x, query, mask, params))

    # f32-matmul path: tight check.
    out_f32 = jax.block_until_ready(
        pointer_network(x, query, mask, params, matmul_dtype=jnp.float32))
    np.testing.assert_allclose(np.asarray(out_f32), np.asarray(ref), rtol=1e-3, atol=1e-3)

    # Default bf16-MXU path (f32 accumulation): loose check.
    out_bf16 = jax.block_until_ready(pointer_network(x, query, mask, params))
    np.testing.assert_allclose(np.asarray(out_bf16), np.asarray(ref), rtol=5e-2, atol=5e-2)

    # mask=None specialization (no mask DMA / select in the kernel).
    out_nomask = jax.block_until_ready(
        pointer_network(x, query, None, params, matmul_dtype=jnp.float32))
    ref_nomask = jax.block_until_ready(pointer_network_ref(x, query, None, params))
    np.testing.assert_allclose(np.asarray(out_nomask), np.asarray(ref_nomask),
                               rtol=1e-3, atol=1e-3)

    print("KERNEL_OK")
</pallas_src>

<mosaic_0001>
module attributes {stable_mosaic.version = 11 : i64} {
  func.func @_pointer_kernel(%arg0: i32, %arg1: i32, %arg2: memref<8x16x32xf32, #tpu.memory_space<vmem>>, %arg3: memref<8x16xi32, #tpu.memory_space<vmem>>, %arg4: memref<32x32xf32, #tpu.memory_space<vmem>>, %arg5: memref<1x32xf32, #tpu.memory_space<vmem>>, %arg6: memref<1x32xf32, #tpu.memory_space<vmem>>, %arg7: memref<8x16xf32, #tpu.memory_space<vmem>>) attributes {dimension_semantics = [#tpu.dimension_semantics<parallel>, #tpu.dimension_semantics<parallel>], iteration_bounds = array<i64: 2, 1>, scalar_prefetch = 0 : i64, scratch_operands = 0 : i64, tpu.core_type = #tpu.core_type<tc>, window_params = [{transform_indices = @transform_0, window_bounds = array<i64: 8, 16, 32>}, {transform_indices = @transform_1, window_bounds = array<i64: 8, 16>}, {pipeline_mode = #tpu.pipeline_mode<synchronous>, transform_indices = @transform_2, window_bounds = array<i64: 32, 32>}, {pipeline_mode = #tpu.pipeline_mode<synchronous>, transform_indices = @transform_3, window_bounds = array<i64: 1, 32>}, {pipeline_mode = #tpu.pipeline_mode<synchronous>, transform_indices = @transform_4, window_bounds = array<i64: 1, 32>}, {transform_indices = @transform_5, window_bounds = array<i64: 8, 16>}]} {
    %c0 = arith.constant 0 : index
    %c0_0 = arith.constant 0 : index
    %c0_1 = arith.constant 0 : index
    %0 = vector.load %arg2[%c0, %c0_0, %c0_1] : memref<8x16x32xf32, #tpu.memory_space<vmem>>, vector<8x16x32xf32>
    %1 = vector.shape_cast %0 : vector<8x16x32xf32> to vector<128x32xf32>
    %c0_2 = arith.constant 0 : index
    %c0_3 = arith.constant 0 : index
    %2 = vector.load %arg4[%c0_2, %c0_3] : memref<32x32xf32, #tpu.memory_space<vmem>>, vector<32x32xf32>
    %cst = arith.constant dense<0.000000e+00> : vector<128x32xf32>
    %3 = tpu.matmul %1, %2, %cst {dimension_numbers = #tpu.dot_dimension_numbers<[1], [0], [0], [1], [0, 0, 1, 1], [], []>} : vector<128x32xf32>, vector<32x32xf32>, vector<128x32xf32> -> vector<128x32xf32>
    %c0_4 = arith.constant 0 : index
    %c0_5 = arith.constant 0 : index
    %4 = vector.load %arg5[%c0_4, %c0_5] : memref<1x32xf32, #tpu.memory_space<vmem>>, vector<1x32xf32>
    %5 = vector.broadcast %4 : vector<1x32xf32> to vector<128x32xf32>
    %6 = arith.addf %3, %5 : vector<128x32xf32>
    %7 = math.tanh %6 : vector<128x32xf32>
    %8 = vector.shape_cast %7 : vector<128x32xf32> to vector<8x16x32xf32>
    %c0_6 = arith.constant 0 : index
    %c0_7 = arith.constant 0 : index
    %9 = vector.load %arg6[%c0_6, %c0_7] : memref<1x32xf32, #tpu.memory_space<vmem>>, vector<1x32xf32>
    %10 = vector.shape_cast %9 : vector<1x32xf32> to vector<1x1x32xf32>
    %11 = vector.broadcast %10 : vector<1x1x32xf32> to vector<8x16x32xf32>
    %12 = arith.mulf %8, %11 : vector<8x16x32xf32>
    %cst_8 = arith.constant dense<0.000000e+00> : vector<8x16xf32>
    %13 = vector.multi_reduction <add>, %12, %cst_8 [2] : vector<8x16x32xf32> to vector<8x16xf32>
    %c0_9 = arith.constant 0 : index
    %c0_10 = arith.constant 0 : index
    %14 = vector.load %arg3[%c0_9, %c0_10] : memref<8x16xi32, #tpu.memory_space<vmem>>, vector<8x16xi32>
    %c0_i32 = arith.constant 0 : i32
    %15 = vector.broadcast %c0_i32 : i32 to vector<8x16xi32>
    %16 = arith.cmpi ne, %14, %15 : vector<8x16xi32>
    %cst_11 = arith.constant 0xFF800000 : f32
    %17 = vector.broadcast %cst_11 : f32 to vector<8x16xf32>
    %18 = arith.select %16, %13, %17 : vector<8x16xi1>, vector<8x16xf32>
    %c0_12 = arith.constant 0 : index
    %c0_13 = arith.constant 0 : index
    %19 = vector.load %arg7[%c0_12, %c0_13] : memref<8x16xf32, #tpu.memory_space<vmem>>, vector<8x16xf32>
    tpu.vector_store %arg7[%c0_12, %c0_13], %18 {strides = array<i32>} : memref<8x16xf32, #tpu.memory_space<vmem>>, vector<8x16xf32>,
    return
  }
  func.func @transform_0(%arg0: i32, %arg1: i32) -> (i32, i32, i32) {
    %c0_i32 = arith.constant 0 : i32
    %c0_i32_0 = arith.constant 0 : i32
    return %arg0, %arg1, %c0_i32 : i32, i32, i32
  }
  func.func @transform_1(%arg0: i32, %arg1: i32) -> (i32, i32) {
    %c0_i32 = arith.constant 0 : i32
    return %arg0, %arg1 : i32, i32
  }
  func.func @transform_2(%arg0: i32, %arg1: i32) -> (i32, i32) {
    %c0_i32 = arith.constant 0 : i32
    %c0_i32_0 = arith.constant 0 : i32
    %c0_i32_1 = arith.constant 0 : i32
    return %c0_i32, %c0_i32_0 : i32, i32
  }
  func.func @transform_3(%arg0: i32, %arg1: i32) -> (i32, i32) {
    %c0_i32 = arith.constant 0 : i32
    %c0_i32_0 = arith.constant 0 : i32
    %c0_i32_1 = arith.constant 0 : i32
    return %c0_i32, %c0_i32_0 : i32, i32
  }
  func.func @transform_4(%arg0: i32, %arg1: i32) -> (i32, i32) {
    %c0_i32 = arith.constant 0 : i32
    %c0_i32_0 = arith.constant 0 : i32
    %c0_i32_1 = arith.constant 0 : i32
    return %c0_i32, %c0_i32_0 : i32, i32
  }
  func.func @transform_5(%arg0: i32, %arg1: i32) -> (i32, i32) {
    %c0_i32 = arith.constant 0 : i32
    return %arg0, %arg1 : i32, i32
  }
}

</mosaic_0001>

<bundles_post_ra>
// kernel: tpu_custom_call.1
= control target key start
LH: loop header
LB: loop body
LE: loop exit
PB: predicated region body
PF: predicated region fallthrough
CT: control target
= control target key end

     0   :  { %s1598_s0 = inlined_call_operand.hbm [shape: f32[16,16,32], index: 0, kind: input, shape index: {}]   ;;  %s1599_s1 = inlined_call_operand.hbm [shape: s32[16,16], index: 1, kind: input, shape index: {}]   ;;  %s1600_s2 = inlined_call_operand.hbm [shape: f32[32,32], index: 2, kind: input, shape index: {}]   ;;  %s1601_s3 = inlined_call_operand.vmem [shape: f32[1,32], index: 3, kind: input, shape index: {}]   ;;  %s1602_s4 = inlined_call_operand.vmem [shape: f32[1,32], index: 4, kind: input, shape index: {}]   ;;  %s1603_s5 = inlined_call_operand.hbm [shape: f32[16,16], index: 5, kind: output, shape index: {}]  }
   0x1   :  { %1611 = sst [smem:[#allocation18_spill]] %s1598_s0 }
   0x2   :  { %1612 = sst [smem:[#allocation19_spill]] %s1600_s2 }
   0x3   :  { %10 = vsyncpa [#allocation3], 0 }
   0x4   :  { %12 = vsyncpa [#allocation3 + $0x1], 0 }
   0x5   :  { %13 = vsyncpa [#allocation6], 0 }
   0x6   :  { %15 = vsyncpa [#allocation6 + $0x1], 0 }
   0x7   :  { %16 = vsyncpa [#allocation4], 0 }
   0x8   :  { %18 = vsyncpa [#allocation4 + $0x1], 0  ;;  %s1288_s18 = smov 0   ;;  %s1290_s19 = smov 0  }
   0x9   :  { %s1292_s20 = smov 0   ;;  %s1294_s21 = smov 0  }
   0xa   :  { %s1296_s22 = smov 0   ;;  %s1298_s23 = smov 0  }
   0xb LB: > { %1613 = sst [smem:[#allocation13_spill]] %s1238_s20  ;;  %s1319_s24 = sadd.s32 4294967295, %s1250_s23   ;;  %s1250_s23 = sphi %s1298_s23, %s24_s23   ;;  %s1246_s22 = sphi %s1296_s22, %s1639_s22   ;;  %s1242_s21 = sphi %s1294_s21, %s1638_s21   ;;  %s1238_s20 = sphi %s1292_s20, %s1634_s20   ;;  %s1234_s19 = sphi %s1290_s19, %s1637_s19   ;;  %s1230_s18 = sphi %s1288_s18, %s1636_s18  }
   0xc   : > { %1614 = sst [smem:[#allocation14_spill]] %s1250_s23  ;;  %s869_s25 = sadd.s32 4294967294, %s1250_s23  }
   0xd   : > { %p58_p0 = scmp.ne.s32.totalorder %s1234_s19, %s1230_s18  ;;  %p59_p1 = scmp.eq.s32.totalorder %s1319_s24, 0 }
   0xe   : > { %p181_p3 = scmp.eq.s32.totalorder %s869_s25, 1  ;;  %p870_p5 = scmp.ge.s32.totalorder %s1250_s23, 1 }
   0xf   : > { %p1328_p4 = por %p59_p1, %p58_p0  ;;  %p188_p7 = scmp.lt.s32.totalorder %s1250_s23, 3 }
  0x10   : > { %p1333_p6 = por %p181_p3, %p58_p0  ;;  %s1252_s29 = smov [#allocation7]  }
  0x11   : > { %p1338_p8 = pnand %p870_p5, %p188_p7  ;;  %s200_s30 = sshll.u32 %s1252_s29, 4  ;;  %s201_s30 = int_to_ptr.vmem [resolvable:$true] %s200_s30 }
  0x12   : > { %s1616_s27 = scalar_select %p1333_p6, 1, 0 }
  0x13   : > { %p978_p9 = pneg %p1338_p8  ;;  %p872_p10 = scmp.ge.s32.totalorder %s1250_s23, 2 }
  0x14   : > { %1617 = sst [smem:[#allocation15_spill]] %s1616_s27  ;;  %s36_s7 = sadd.s32 1, %s1246_s22 }
  0x15   : > { %p1347_p11 = pnand %p978_p9, %p59_p1  ;;  %s1091_s8 = scalar_lea.vmem %s201_s30, 512 }
  0x16   : > { %p1092_p13 = scmp.ne.s32.totalorder %s201_s30, %s1091_s8  ;;  %p1099_p5 = scmp.lt.s32.totalorder %s201_s30, %s201_s30 }
  0x17   : > { %p1082_p12 = pneg %p1347_p11  ;;  %p1100_p7 = scmp.lt.s32.totalorder %s1091_s8, %s1091_s8 }
  0x19   : > { %p1094_p0 = pnand %p1092_p13, %p1082_p12  ;;  %p1101_p2 = por %p1100_p7, %p1099_p5 }
  0x1b   : > { %p1095_p3 = pneg %p1094_p0 }
  0x1d   : > { %p1102_p6 = pnand %p1101_p2, %p1095_p3 }
  0x1f   : > { %1105 = shalt.err (!%p1102_p6)
}
  0x20   : > { %s1604_s9 = smov 128   ;;  %s1605_s10 = smov 8  }
  0x21   : > { %s1620_s2 = sld [smem:[#allocation19_spill]]  ;;  %p38_p2 = scmp.ge.s32.totalorder %s36_s7, 2 }
  0x22   : > { %s45_s13 = sadd.s32 1, %s1238_s20  ;;  %p52_p6 = scmp.ne.s32.totalorder %s1238_s20, %s1234_s19 }
  0x23   : > { %p53_p9 = scmp.eq.s32.totalorder %s1250_s23, 0  ;;  %s1641_s7 = smov (%p38_p2, %s36_s7), 0 }
  0x24   : > { %1621 = sst [smem:[#allocation16_spill]] %s1641_s7  ;;  %p1623_p13 = scmp.eq.s32.totalorder %s1319_s24, 1 }
  0x25   : > { %p1368_p12 = por %p53_p9, %p52_p6  ;;  %s40_s16 = ssub.s32 %s1246_s22, %s1641_s7 }
  0x26   : > { %p1374_p0 = por %p1623_p13, %p52_p6  ;;  %p43_p3 = scmp.eq.s32.totalorder %s40_s16, 0 }
  0x27   : > { %981 = dma.hbm_to_vmem [thread:$0]  (!%p1347_p11), %s1620_s2, 512, %s201_s30, [#allocation6], %s1604_s9, %s1604_s9, %s1605_s10  }
  0x28   : > { %p994_p11 = scmp.lt.s32.totalorder %s1250_s23, 2  ;;  %s1382_s17 = sand.u32 1, %s1238_s20  }
  0x29   : > { %s873_s25 = sshll.u32 %s1382_s17, 7  ;;  %s907_s30 = sshll.u32 %s1246_s22, 11 }
  0x2a   : > { %s1386_s29 = scalar_select %p43_p3, %s1238_s20, %s45_s13  }
  0x2b   : > { %s1626_s0 = sld [smem:[#allocation18_spill]]  ;;  %s224_s12 = scalar_lea.vmem [#allocation2], %s873_s25 }
  0x2c   : > { %1625 = sst [smem:[#allocation17_spill]] %s1386_s29  ;;  %s234_s9 = sshll.u32 %s224_s12, 4  ;;  %s235_s9 = int_to_ptr.vmem [resolvable:$true] %s234_s9 }
  0x2d   : > { %p1394_p5 = pnand %p994_p11, %p1368_p12  ;;  %s244_s16 = sand.u32 1, %s1250_s23  }
  0x2e   : > { %s877_s2 = sshll.u32 %s1382_s17, 3  ;;  %s221_s7 = scalar_lea.sflag [#allocation3], %s1382_s17 }
  0x2f   : > { %p1108_p7 = pneg %p1394_p5  ;;  %s1119_s13 = scalar_lea.vmem %s235_s9, 2048 }
  0x30   : > { %p1120_p2 = scmp.ne.s32.totalorder %s235_s9, %s1119_s13  ;;  %s1255_s25 = smov [#allocation2]  }
  0x31   : > { %s233_s11 = scalar_lea.hbm %s1626_s0, %s907_s30  ;;  %s1124_s30 = sshll.u32 %s1255_s25, 4  ;;  %s1125_s30 = int_to_ptr.vmem [resolvable:$false] %s1124_s30 }
  0x32   : > { %p1122_p6 = pnand %p1120_p2, %p1108_p7  ;;  %s1126_s14 = scalar_lea.vmem %s1125_s30, 4096 }
  0x33   : > { %p1127_p12 = scmp.lt.s32.totalorder %s235_s9, %s1125_s30  ;;  %p1128_p13 = scmp.lt.s32.totalorder %s1126_s14, %s1119_s13 }
  0x34   : > { %p1123_p9 = pneg %p1122_p6 }
  0x35   : > { %p1129_p11 = por %p1128_p13, %p1127_p12 }
  0x37   : > { %p1130_p3 = pnand %p1129_p11, %p1123_p9 }
  0x39   : > { %1133 = shalt.err (!%p1130_p3)
}
  0x3a   : > { %s1628_s17 = smov 8   ;;  %s1629_s6 = smov 128  }
  0x3b   : > { %985 = dma.hbm_to_vmem [thread:$0]  (!%p1394_p5), %s233_s11, 2048, %s235_s9, %s221_s7, %s1629_s6, %s1629_s6, %s1628_s17  }
  0x3c   : > { %s878_s8 = sshll.u32 %s1246_s22, 7  ;;  %s248_s29 = scalar_lea.vmem [#allocation5], %s877_s2 }
  0x3d   : > { %s254_s25 = scalar_lea.hbm %s1599_s1, %s878_s8  ;;  %s256_s20 = sshll.u32 %s248_s29, 4  ;;  %s257_s20 = int_to_ptr.vmem [resolvable:$true] %s256_s20 }
  0x3e   : > { %s245_s13 = scalar_lea.sflag [#allocation6], %s244_s16  ;;  %s1147_s30 = scalar_lea.vmem %s257_s20, 128 }
  0x3f   : > { %p1148_p2 = scmp.ne.s32.totalorder %s257_s20, %s1147_s30  ;;  %s1256_s14 = smov [#allocation5]  }
  0x40   : > { %s1152_s23 = sshll.u32 %s1256_s14, 4  ;;  %s1153_s23 = int_to_ptr.vmem [resolvable:$false] %s1152_s23 }
  0x41   : > { %p1150_p6 = pnand %p1148_p2, %p1108_p7  ;;  %s1154_s27 = scalar_lea.vmem %s1153_s23, 256 }
  0x42   : > { %p1155_p12 = scmp.lt.s32.totalorder %s257_s20, %s1153_s23  ;;  %p1156_p13 = scmp.lt.s32.totalorder %s1154_s27, %s1147_s30 }
  0x43   : > { %p1151_p9 = pneg %p1150_p6 }
  0x44   : > { %p1157_p11 = por %p1156_p13, %p1155_p12 }
  0x46   : > { %p1158_p3 = pnand %p1157_p11, %p1151_p9 }
  0x48   : > { %1161 = shalt.err (!%p1158_p3)
}
  0x49   : > { %988 = dma.hbm_to_vmem [thread:$0]  (!%p1394_p5), %s254_s25, 128, %s257_s20, %s245_s13  }
  0x4a   : > { %265 = sbr.rel (%p1338_p8) target bundleno = 492 (0x1ec), region = 40  ;;  %s1423_s0 = sand.u32 (!%p1338_p8), 1, %s1234_s19  }
  0x4b   : > { %s880_s2 = sshll.u32 (!%p1338_p8), %s1423_s0, 7  ;;  %s268_s7 = scalar_lea.sflag (!%p1338_p8), [#allocation3], %s1423_s0 }
  0x4c   : > { %s1427_s9 = scalar_lea.vmem (!%p1338_p8), [#allocation2], %s880_s2 }
  0x4f   : > { %1213 = dma.done.wait (%p1328_p4), %s268_s7, 2048  }
  0x50   : > { %1215 = vsyncadd (%p1328_p4), %s268_s7, 4294965248  ;;  %s276_s20 = sand.u32 1, %s1319_s24   ;;  %s881_s23 = sshll.u32 %s1423_s0, 3 }
  0x51   : > { %s277_s27 = scalar_lea.sflag [#allocation6], %s276_s20  ;;  %s1437_s28 = scalar_lea.vmem [#allocation5], %s881_s23 }
  0x52   : > { %1217 = dma.done.wait (%p1328_p4), %s277_s27, 128  }
  0x53   : > { %1219 = vsyncadd (%p1328_p4), %s277_s27, 4294967168 }
  0x54   : > { %1221 = dma.done.wait (%p59_p1), [#allocation6], 512  }
  0x55   : > { %1223 = vsyncadd (%p59_p1), [#allocation6], 4294966784  ;;  %v337_v0 = vld [vmem:[#allocation7 + $0x18] sm:$0xff]  ;;  %v336_v1 = vld [vmem:[#allocation7 + $0x10] sm:$0xff]  ;;  %vm345_vm0 = vcmask 261120   ;;  %vm655_vm1 = vcmask 130112  }
  0x56   : > { %928 = vmatprep.subr.mxu0 %v337_v0  ;;  %960 = vmatprep.subr.mxu1 %v337_v0  ;;  %v335_v2 = vld [vmem:[#allocation7 + $0x8] sm:$0xff]  ;;  %v334_v3 = vld [vmem:[#allocation7] sm:$0xff]  ;;  %v318_v4 = vld [vmem:[%s1427_s9] sm:$0xff]  ;;  %vm720_vm2 = vcmask 1041409   ;;  %vm722_vm3 = vcmask 1042434   ;;  %vm724_vm4 = vcmask 1043459  }
  0x57   : > { %929 = vmatpush3.msra.mxu0 %v337_v0  ;;  %964 = vmatpush3.msra.mxu1 %v337_v0  ;;  %v326_v5 = vld [vmem:[%s1427_s9 + $0x40] sm:$0xff]  ;;  %v319_v6 = vld [vmem:[%s1427_s9 + $0x8] sm:$0xff]  ;;  %v320_v8 = vld [vmem:[%s1427_s9 + $0x10] sm:$0xff]  ;;  %vm726_vm5 = vcmask 1044484   ;;  %vm728_vm6 = vcmask 1045509   ;;  %vm730_vm7 = vcmask 1046534  }
  0x58   : > { %930 = vmatprep.subr.mxu0 %v336_v1  ;;  %961 = vmatprep.subr.mxu1 %v336_v1  ;;  %v327_v7 = vld [vmem:[%s1427_s9 + $0x48] sm:$0xff]  ;;  %v328_v9 = vld [vmem:[%s1427_s9 + $0x50] sm:$0xff]  ;;  %v321_v10 = vld [vmem:[%s1427_s9 + $0x18] sm:$0xff]  ;;  %vm732_vm8 = vcmask 1047559   ;;  %s903_s11 = sshll.u32 %s1242_s21, 7  ;;  %s315_s16 = scalar_lea.vmem [#allocation8], %s881_s23 }
  0x59   : > { %931 = vmatpush3.msra.mxu0 %v336_v1  ;;  %965 = vmatpush3.msra.mxu1 %v336_v1  ;;  %v329_v11 = vld [vmem:[%s1427_s9 + $0x58] sm:$0xff]  ;;  %v322_v12 = vld [vmem:[%s1427_s9 + $0x20] sm:$0xff]  ;;  %v323_v14 = vld [vmem:[%s1427_s9 + $0x28] sm:$0xff]  ;;  %s753_s17 = sshll.u32 %s315_s16, 4  ;;  %vm736_vm10 = vcmask 130048   ;;  %s1556_s12 = scalar_lea.hbm %s1603_s5, %s903_s11  ;;  %s754_s17 = int_to_ptr.vmem [resolvable:$true] %s753_s17 }
  0x5a   : > { %932 = vmatprep.subr.mxu0 %v335_v2  ;;  %962 = vmatprep.subr.mxu1 %v335_v2  ;;  %v330_v13 = vld [vmem:[%s1427_s9 + $0x60] sm:$0xff]  ;;  %v331_v15 = vld [vmem:[%s1427_s9 + $0x68] sm:$0xff]  ;;  %v324_v16 = vld [vmem:[%s1427_s9 + $0x30] sm:$0xff]  ;;  %s739_s21 = scalar_lea.sflag [#allocation4], %s1423_s0  ;;  %s1162_s25 = scalar_lea.vmem %s754_s17, 128 }
  0x5b   : > { %933 = vmatpush3.msra.mxu0 %v335_v2  ;;  %966 = vmatpush3.msra.mxu1 %v335_v2  ;;  %v332_v17 = vld [vmem:[%s1427_s9 + $0x70] sm:$0xff]  ;;  %v325_v18 = vld [vmem:[%s1427_s9 + $0x38] sm:$0xff]  ;;  %v1482_v20 = vld [vmem:[%s1601_s3] ss:$0 sm:$0xff]  ;;  %p1163_p1 = scmp.ne.s32.totalorder %s754_s17, %s1162_s25  ;;  %s1257_s13 = smov [#allocation8]  }
  0x5c   : > { %934 = vmatprep.subr.mxu0 %v334_v3  ;;  %963 = vmatprep.subr.mxu1 %v334_v3  ;;  %v333_v19 = vld [vmem:[%s1427_s9 + $0x78] sm:$0xff]  ;;  %v1497_v44 = vld [vmem:[%s1602_s4] ss:$0 sm:$0xff]  ;;  %s1166_s30 = sshll.u32 %s1257_s13, 4  ;;  %s1167_s30 = int_to_ptr.vmem [resolvable:$false] %s1166_s30 }
  0x5d   : > { %935 = vmatpush3.msra.mxu0 %v334_v3  ;;  %967 = vmatpush3.msra.mxu1 %v334_v3  ;;  %p1164_p4 = pnand %p1163_p1, %p1374_p0  ;;  %s1168_s14 = scalar_lea.vmem %s1167_s30, 256 }
  0x5e   : > { %936 = vmatprep.mubr.msk.f32.mxu0 %vm345_vm0, %v318_v4  ;;  %948 = vmatprep.mubr.msk.f32.mxu1 %vm345_vm0, %v326_v5  ;;  %p1169_p5 = scmp.lt.s32.totalorder %s754_s17, %s1167_s30  ;;  %p1170_p7 = scmp.lt.s32.totalorder %s1168_s14, %s1162_s25 }
  0x5f   : > { %937 = vmatmul.mubr.msk.f32.vlgmr.msra.gmra.mxu0 %vm345_vm0, %v319_v6  ;;  %949 = vmatmul.mubr.msk.f32.vlgmr.msra.gmra.mxu1 %vm345_vm0, %v327_v7  ;;  %p1165_p8 = pneg %p1164_p4 }
  0x60   : > { %939 = vmatprep.mubr.msk.f32.mxu0 %vm345_vm0, %v320_v8  ;;  %951 = vmatprep.mubr.msk.f32.mxu1 %vm345_vm0, %v328_v9  ;;  %p1171_p2 = por %p1170_p7, %p1169_p5 }
  0x62   : > { %p1172_p6 = pnand %p1171_p2, %p1165_p8 }
  0x63   : > { %940 = vmatmul.mubr.msk.f32.gmra.mxu0 %vm345_vm0, %v321_v10  ;;  %952 = vmatmul.mubr.msk.f32.gmra.mxu1 %vm345_vm0, %v329_v11 }
  0x64   : > { %942 = vmatprep.mubr.msk.f32.mxu0 %vm345_vm0, %v322_v12  ;;  %954 = vmatprep.mubr.msk.f32.mxu1 %vm345_vm0, %v330_v13 }
  0x67   : > { %943 = vmatmul.mubr.msk.f32.gmra.mxu0 %vm345_vm0, %v323_v14  ;;  %955 = vmatmul.mubr.msk.f32.gmra.mxu1 %vm345_vm0, %v331_v15 }
  0x68   : > { %945 = vmatprep.mubr.msk.f32.mxu0 %vm345_vm0, %v324_v16  ;;  %957 = vmatprep.mubr.msk.f32.mxu1 %vm345_vm0, %v332_v17 }
  0x6b   : > { %946 = vmatmul.mubr.msk.f32.gmra.mxu0 %vm345_vm0, %v325_v18  ;;  %958 = vmatmul.mubr.msk.f32.gmra.mxu1 %vm345_vm0, %v333_v19 }
 0x11f   : > { %v938_v21 = vpop.f32.mrf.mxu0  ;;  %v950_v22 = vpop.f32.mrf.mxu1 }
 0x120   : > { %v466_v23 = vadd.f32 %v938_v21, %v1482_v20  ;;  %v506_v24 = vadd.f32 %v950_v22, %v1482_v20 }
 0x121   : > { %v460_v25 = vpop.f32.mrf.mxu0  ;;  %v500_v26 = vpop.f32.mrf.mxu1 }
 0x122   : > { %1048 = vtanh.f32 %v466_v23  ;;  %v461_v27 = vadd.f32 %v1482_v20, %v460_v25  ;;  %v501_v28 = vadd.f32 %v1482_v20, %v500_v26 }
 0x123   : > { %1050 = vtanh.f32 %v506_v24  ;;  %v941_v29 = vpop.f32.mrf.mxu0  ;;  %v953_v30 = vpop.f32.mrf.mxu1 }
 0x124   : > { %1052 = vtanh.f32 %v461_v27  ;;  %v476_v31 = vadd.f32 %v941_v29, %v1482_v20  ;;  %v516_v32 = vadd.f32 %v953_v30, %v1482_v20 }
 0x125   : > { %1054 = vtanh.f32 %v501_v28  ;;  %v470_v33 = vpop.f32.mrf.mxu0  ;;  %v510_v34 = vpop.f32.mrf.mxu1 }
 0x126   : > { %1056 = vtanh.f32 %v476_v31  ;;  %v511_v35 = vadd.f32 %v1482_v20, %v510_v34  ;;  %v471_v36 = vadd.f32 %v1482_v20, %v470_v33 }
 0x127   : > { %1058 = vtanh.f32 %v516_v32  ;;  %v944_v37 = vpop.f32.mrf.mxu0  ;;  %v956_v38 = vpop.f32.mrf.mxu1 }
 0x128   : > { %1060 = vtanh.f32 %v511_v35  ;;  %v486_v41 = vadd.f32 %v944_v37, %v1482_v20  ;;  %v526_v48 = vadd.f32 %v956_v38, %v1482_v20 }
 0x129   : > { %v480_v39 = vpop.f32.mrf.mxu0  ;;  %1062 = vtanh.f32 %v471_v36  ;;  %v520_v42 = vpop.f32.mrf.mxu1 }
 0x12a   : > { %v481_v40 = vadd.f32 %v1482_v20, %v480_v39  ;;  %v521_v45 = vadd.f32 %v1482_v20, %v520_v42  ;;  %v644_v42 = vlaneseq }
 0x12b   : > { %v947_v43 = vpop.f32.mrf.mxu0  ;;  %v959_v46 = vpop.f32.mrf.mxu1 }
 0x12c   : > { %1064 = vtanh.f32 %v481_v40  ;;  %v496_v61 = vadd.f32 %v947_v43, %v1482_v20  ;;  %v536_v6 = vadd.f32 %v959_v46, %v1482_v20  ;;  %v645_v46 = vand.u32 127, %v644_v42 }
 0x12d   : > { %1066 = vtanh.f32 %v486_v41  ;;  %v490_v49 = vpop.f32.mrf.mxu0  ;;  %v530_v58 = vpop.f32.mrf.mxu1 }
 0x12e   : > { %1068 = vtanh.f32 %v521_v45  ;;  %v491_v56 = vadd.f32 %v1482_v20, %v490_v49  ;;  %v531_v0 = vadd.f32 %v1482_v20, %v530_v58  ;;  %v647_v49 = vshrl.u32 %v644_v42, 7 }
 0x12f   : > { %v1049_v47 = vpop.eup %1048  ;;  %1070 = vtanh.f32 %v526_v48 }
 0x130   : > { %v1051_v50 = vpop.eup %1050  ;;  %v563_v51 = vmul.f32 %v1049_v47, %v1497_v44  ;;  %1072 = vtanh.f32 %v491_v56 }
 0x131   : > { %v1053_v52 = vpop.eup %1052  ;;  %v571_v53 = vmul.f32 %v1051_v50, %v1497_v44  ;;  %1074 = vtanh.f32 %v496_v61  ;;  %v650_v50 = vadd.s32 4294967288, %v645_v46 }
 0x132   : > { %v1055_v54 = vpop.eup %1054  ;;  %v581_v55 = vsel %vm345_vm0, %v563_v51, 0.0  ;;  %v562_v57 = vmul.f32 %v1053_v52, %v1497_v44  ;;  %1076 = vtanh.f32 %v531_v0  ;;  %v648_v52 = vsub.s32 %v645_v46, %v647_v49 }
 0x133   : > { %v1057_v59 = vpop.eup %1056  ;;  %v605_v60 = vsel %vm345_vm0, %v571_v53, 0.0  ;;  %582 = vadd.xlane.f32.xlu0 %v581_v55  ;;  %v570_v4 = vmul.f32 %v1055_v54, %v1497_v44  ;;  %1078 = vtanh.f32 %v536_v6  ;;  %v653_v53 = vsub.s32 %v650_v50, %v647_v49 }
 0x134   : > { %v1059_v62 = vpop.eup %1058  ;;  %606 = vadd.xlane.f32.xlu1 %v605_v60  ;;  %v565_v63 = vmul.f32 %v1057_v59, %v1497_v44  ;;  %v578_v3 = vsel %vm345_vm0, %v562_v57, 0.0 }
 0x135   : > { %v573_v1 = vmul.f32 %v1059_v62, %v1497_v44  ;;  %v1061_v5 = vpop.eup %1060  ;;  %v602_v9 = vsel %vm345_vm0, %v570_v4, 0.0 }
 0x136   : > { %v587_v2 = vsel %vm345_vm0, %v565_v63, 0.0  ;;  %v1063_v7 = vpop.eup %1062  ;;  %v572_v10 = vmul.f32 %v1061_v5, %v1497_v44 }
 0x137   : > { %579 = vadd.xlane.f32.xlu0 %v578_v3  ;;  %v611_v8 = vsel %vm345_vm0, %v573_v1, 0.0  ;;  %v564_v12 = vmul.f32 %v1063_v7, %v1497_v44 }
 0x138   : > { %588 = vadd.xlane.f32.xlu1 %v587_v2  ;;  %v608_v14 = vsel %vm345_vm0, %v572_v10, 0.0 }
 0x139   : > { %v1065_v11 = vpop.eup %1064  ;;  %v584_v17 = vsel %vm345_vm0, %v564_v12, 0.0 }
 0x13a   : > { %v1067_v13 = vpop.eup %1066  ;;  %v566_v15 = vmul.f32 %v1065_v11, %v1497_v44 }
 0x13b   : > { %603 = vadd.xlane.f32.xlu0 %v602_v9  ;;  %v1069_v16 = vpop.eup %1068  ;;  %v567_v18 = vmul.f32 %v1067_v13, %v1497_v44 }
 0x13c   : > { %612 = vadd.xlane.f32.xlu1 %v611_v8  ;;  %v1071_v19 = vpop.eup %1070  ;;  %v590_v20 = vsel %vm345_vm0, %v566_v15, 0.0  ;;  %v574_v21 = vmul.f32 %v1069_v16, %v1497_v44 }
 0x13d   : > { %v1073_v22 = vpop.eup %1072  ;;  %v593_v23 = vsel %vm345_vm0, %v567_v18, 0.0  ;;  %v575_v24 = vmul.f32 %v1071_v19, %v1497_v44 }
 0x13e   : > { %v1075_v25 = vpop.eup %1074  ;;  %v614_v26 = vsel %vm345_vm0, %v574_v21, 0.0  ;;  %v568_v27 = vmul.f32 %v1073_v22, %v1497_v44 }
 0x13f   : > { %609 = vadd.xlane.f32.xlu0 %v608_v14  ;;  %v1077_v28 = vpop.eup %1076  ;;  %v617_v29 = vsel %vm345_vm0, %v575_v24, 0.0  ;;  %v569_v30 = vmul.f32 %v1075_v25, %v1497_v44  ;;  %v626_v14 = vld [vmem:[%s1437_s28] sm:$0xff] }
 0x140   : > { %585 = vadd.xlane.f32.xlu1 %v584_v17  ;;  %v1079_v31 = vpop.eup %1078  ;;  %v596_v32 = vsel %vm345_vm0, %v568_v27, 0.0  ;;  %v576_v33 = vmul.f32 %v1077_v28, %v1497_v44  ;;  %vm627_vm9 = vcmp.ne.s32.totalorder %v626_v14, 0 }
 0x141   : > { %v599_v34 = vsel %vm345_vm0, %v569_v30, 0.0  ;;  %v577_v35 = vmul.f32 %v1079_v31, %v1497_v44 }
 0x142   : > { %v620_v36 = vsel %vm345_vm0, %v576_v33, 0.0 }
 0x143   : > { %591 = vadd.xlane.f32.xlu0 %v590_v20  ;;  %v623_v37 = vsel %vm345_vm0, %v577_v35, 0.0 }
 0x144   : > { %594 = vadd.xlane.f32.xlu1 %v593_v23 }
 0x147   : > { %615 = vadd.xlane.f32.xlu0 %v614_v26 }
 0x148   : > { %618 = vadd.xlane.f32.xlu1 %v617_v29 }
 0x14b   : > { %597 = vadd.xlane.f32.xlu0 %v596_v32 }
 0x14c   : > { %600 = vadd.xlane.f32.xlu1 %v599_v34 }
 0x14f   : > { %621 = vadd.xlane.f32.xlu0 %v620_v36 }
 0x150   : > { %624 = vadd.xlane.f32.xlu1 %v623_v37 }
 0x1bc   : > { %v583_v38 = vpop.xlane.xlu0 %582 }
 0x1bd   : > { %v607_v39 = vpop.xlane.xlu1 %606  ;;  %v654_v61 = vrot.slane %v583_v38, %v653_v53 }
 0x1be   : > { %v691_v7 = vrot.slane %v607_v39, %v653_v53 }
 0x1c0   : > { %v580_v40 = vpop.xlane.xlu0 %579 }
 0x1c1   : > { %v589_v41 = vpop.xlane.xlu1 %588  ;;  %v649_v60 = vrot.slane %v580_v40, %v648_v52 }
 0x1c2   : > { %v664_v59 = vrot.slane %v589_v41, %v653_v53 }
 0x1c3   : > { %v656_v4 = vsel %vm655_vm1, %v654_v61, %v649_v60 }
 0x1c4   : > { %v604_v43 = vpop.xlane.xlu0 %603 }
 0x1c5   : > { %v613_v45 = vpop.xlane.xlu1 %612  ;;  %v687_v0 = vrot.slane %v604_v43, %v648_v52 }
 0x1c6   : > { %v700_v11 = vrot.slane %v613_v45, %v653_v53 }
 0x1c7   : > { %v692_v16 = vsel %vm655_vm1, %v691_v7, %v687_v0 }
 0x1c8   : > { %v610_v47 = vpop.xlane.xlu0 %609 }
 0x1c9   : > { %v586_v48 = vpop.xlane.xlu1 %585  ;;  %v696_v5 = vrot.slane %v610_v47, %v648_v52 }
 0x1ca   : > { %v660_v54 = vrot.slane %v586_v48, %v648_v52 }
 0x1cb   : > { %v701_v20 = vsel %vm655_vm1, %v700_v11, %v696_v5 }
 0x1cc   : > { %v592_v44 = vpop.xlane.xlu0 %591  ;;  %v665_v62 = vsel %vm655_vm1, %v664_v59, %v660_v54 }
 0x1cd   : > { %v595_v51 = vpop.xlane.xlu1 %594  ;;  %v669_v57 = vrot.slane %v592_v44, %v648_v52  ;;  %v721_v8 = vsel %vm720_vm2, %v665_v62, %v656_v4 }
 0x1ce   : > { %v673_v56 = vrot.slane %v595_v51, %v653_v53 }
 0x1d0   : > { %v616_v55 = vpop.xlane.xlu0 %615  ;;  %v674_v1 = vsel %vm655_vm1, %v673_v56, %v669_v57 }
 0x1d1   : > { %v619_v58 = vpop.xlane.xlu1 %618  ;;  %v705_v10 = vrot.slane %v616_v55, %v648_v52  ;;  %v723_v12 = vsel %vm722_vm3, %v674_v1, %v721_v8 }
 0x1d2   : > { %v709_v9 = vrot.slane %v619_v58, %v653_v53 }
 0x1d4   : > { %v598_v63 = vpop.xlane.xlu0 %597  ;;  %v710_v23 = vsel %vm655_vm1, %v709_v9, %v705_v10 }
 0x1d5   : > { %v601_v2 = vpop.xlane.xlu1 %600  ;;  %v678_v3 = vrot.slane %v598_v63, %v648_v52 }
 0x1d6   : > { %v682_v6 = vrot.slane %v601_v2, %v653_v53 }
 0x1d8   : > { %v683_v13 = vsel %vm655_vm1, %v682_v6, %v678_v3  ;;  %v622_v15 = vpop.xlane.xlu0 %621 }
 0x1d9   : > { %v725_v17 = vsel %vm724_vm4, %v683_v13, %v723_v12  ;;  %v625_v18 = vpop.xlane.xlu1 %624  ;;  %v714_v19 = vrot.slane %v622_v15, %v648_v52 }
 0x1da   : > { %v727_v21 = vsel %vm726_vm5, %v692_v16, %v725_v17  ;;  %v718_v22 = vrot.slane %v625_v18, %v653_v53 }
 0x1db   : > { %v729_v24 = vsel %vm728_vm6, %v701_v20, %v727_v21 }
 0x1dc   : > { %v731_v25 = vsel %vm730_vm7, %v710_v23, %v729_v24  ;;  %v719_v26 = vsel %vm655_vm1, %v718_v22, %v714_v19 }
 0x1dd   : > { %v733_v27 = vsel %vm732_vm8, %v719_v26, %v731_v25 }
 0x1de   : > { %v735_v28 = vsel %vm627_vm9, %v733_v27, -inf }
 0x1df   : > { %737 = vst.msk [vmem:[%s315_s16] sm:$0xff] %vm736_vm10, %v735_v28 }
 0x1e0   : > { %1175 = shalt.err (!%p1172_p6)
}
 0x1e1   : > { %s1176_s2 = scalar_lea.hbm %s1556_s12, 128  ;;  %s1180_s9 = scalar_lea.hbm %s1603_s5, 256 }
 0x1e2   : > { %p1177_p9 = scmp.ne.s32.totalorder %s1556_s12, %s1176_s2  ;;  %p1181_p11 = scmp.lt.s32.totalorder %s1556_s12, %s1603_s5 }
 0x1e3   : > { %p1182_p3 = scmp.lt.s32.totalorder %s1180_s9, %s1176_s2 }
 0x1e4   : > { %p1178_p12 = pnand %p1177_p9, %p1374_p0 }
 0x1e5   : > { %p1183_p1 = por %p1182_p3, %p1181_p11 }
 0x1e6   : > { %p1179_p13 = pneg %p1178_p12 }
 0x1e8   : > { %p1184_p4 = pnand %p1183_p1, %p1179_p13 }
 0x1ea   : > { %1187 = shalt.err (!%p1184_p4)
}
 0x1eb   : > { %976 = dma.vmem_to_hbm [thread:$0]  (%p1374_p0), %s754_s17, 128, %s1556_s12, %s739_s21  }
 0x1ec PF: > { %s1630_s27 = sld [smem:[#allocation15_spill]]  ;;  %s765_s24 = sand.u32 1, %s1230_s18  }
 0x1ed   : > { %s1631_s28 = sld [smem:[#allocation14_spill]]  ;;  %s766_s26 = scalar_lea.sflag [#allocation4], %s765_s24 }
 0x1f2   : > { %p1632_p8 = scmp.ne.s32.totalorder %s1630_s27, 0 }
 0x1f4   : > { %p990_p5 = pnand %p872_p10, %p1632_p8 }
 0x1f6   : > { %p991_p7 = pneg %p990_p5 }
 0x1f8   : > { %1225 = dma.done.wait (%p991_p7), %s766_s26, 128  }
 0x1f9   : > { %1227 = vsyncadd (%p991_p7), %s766_s26, 4294967168  ;;  %s24_s23 = sadd.s32 1, %s1631_s28   ;;  %s1633_s10 = sld [smem:[#allocation13_spill]] }
 0x1fa   : > { %p21_p2 = scmp.ge.s32.totalorder %s24_s23, 4   ;;  %s1634_s20 = sld [smem:[#allocation17_spill]] }
 0x1fb   : > { %s1635_s15 = sld [smem:[#allocation16_spill]]  ;;  %s1636_s18 = smov %s1234_s19 }
 0x1fc   : > { %s1638_s21 = smov %s1246_s22 }
 0x1fd   :  { %23 = sbr.rel (!%p21_p2) target bundleno = 11 (0xb), region = 102 }
 0x1ff   : > { %s1637_s19 = smov %s1633_s10 }
 0x201   : > { %s1639_s22 = smov %s1635_s15 }
 0x202   :  { %771 = vsyncpa [#allocation3], 1 }
 0x203   :  { %773 = vsyncpa [#allocation3 + $0x1], 1 }
 0x204   :  { %774 = vsyncpa [#allocation6], 1 }
 0x205   :  { %776 = vsyncpa [#allocation6 + $0x1], 1 }
 0x206   :  { %777 = vsyncpa [#allocation4], 1 }
 0x207   :  { %779 = vsyncpa [#allocation4 + $0x1], 1 }

</bundles_post_ra>
